<compile_context>
chip_gen: v7x
topology: tpu7x:2x2x1
jax: 0.10.0
libtpu: 0.0.40
codegen_flags: <defaults>
</compile_context>

<pallas_src>
import functools

import jax
import jax.numpy as jnp
from jax import lax
from jax.experimental import pallas as pl
from jax.experimental.pallas import tpu as pltpu

EPS = 1e-5
LANE = 128
_TILE_M_CAP = 2048   # rows per 1x1-stage tile (multiple of 16 for bf16 packing)


# ------------------------------ small helpers -------------------------------

def _round_up(x, m):
    return (x + m - 1) // m * m


def _pick_tile_m(m):
    # cdiv grid + in-kernel masking => any M works; keep tiles large (the 1x1
    # stages are HBM-bound and larger tiles amortize ~0.35us per grid step).
    return max(16, min(_TILE_M_CAP, _round_up(m, 16)))


def _vmem_limit_bytes():
    # Generation-tuned scoped-VMEM budget: ~3/4 of physical VMEM, capped at
    # 96 MiB (128 MiB on v5e/v6e -> 96 MiB; 64 MiB on v7x -> 48 MiB).
    try:
        cap = int(pltpu.get_tpu_info().vmem_capacity_bytes)
        return int(min(cap * 3 // 4, 96 * 1024 * 1024))
    except Exception:
        return 48 * 1024 * 1024   # safe on v7x


_VMEM_LIMIT = None


def _compiler_params(sem):
    global _VMEM_LIMIT
    if _VMEM_LIMIT is None:
        _VMEM_LIMIT = _vmem_limit_bytes()
    return pltpu.CompilerParams(dimension_semantics=sem,
                                vmem_limit_bytes=_VMEM_LIMIT)


def _pad_last(a, target):
    pad = target - a.shape[-1]
    if pad == 0:
        return a
    return jnp.pad(a, [(0, 0)] * (a.ndim - 1) + [(0, pad)])


def _pad_matrix(w, rows, cols):
    return jnp.pad(w, ((0, rows - w.shape[0]), (0, cols - w.shape[1])))


def _bn_scale_shift(psum, pssq, gamma, beta, m):
    # Reduce per-tile partial stats (pairwise, f32) then fold BN into a single
    # per-channel scale/shift.  var = E[y^2] - mean^2 (single sweep).
    # TODO(synk): switch to a shifted / Welford formulation if |mean| >> std.
    s = psum.sum(axis=0, keepdims=True)
    ss = pssq.sum(axis=0, keepdims=True)
    mean = s / m
    var = ss / m - mean * mean
    scale = gamma * lax.rsqrt(var + EPS)
    shift = beta - mean * scale
    return scale, shift


# --------------------------------- kernels ----------------------------------

def _partial_stats(y, tm, cout, m_total):
    # y: (tm, cout) f32.  Mask ragged-tail rows (cdiv grid) and fold into an
    # (8, cout) per-tile partial sum / sum-of-squares slab (f32).
    row = lax.broadcasted_iota(jnp.int32, (tm, 1), 0) + pl.program_id(0) * tm
    ym = jnp.where(row < m_total, y, 0.0)
    ps = ym.reshape(tm // 8, 8, cout).sum(axis=0)
    pq = (ym * ym).reshape(tm // 8, 8, cout).sum(axis=0)
    return ps, pq


def _conv1x1_stats_kernel(x_ref, w_ref, y_ref, ps_ref, pq_ref, *, m_total):
    # y = x @ w (conv bias dropped: cancelled exactly by training-mode BN mean
    # subtraction).  Emits bf16 activations + per-tile partial BN statistics.
    tm, cout = y_ref.shape
    y = jnp.dot(x_ref[...].astype(jnp.bfloat16), w_ref[...],
                preferred_element_type=jnp.float32)
    y_ref[...] = y.astype(y_ref.dtype)
    ps_ref[...], pq_ref[...] = _partial_stats(y, tm, cout, m_total)


def _norm_relu_conv1x1_stats_kernel(yp_ref, sc_ref, sh_ref, w_ref,
                                    y_ref, ps_ref, pq_ref, *, m_total):
    # Fused: BN-normalize previous stage (precomputed scale/shift) + ReLU,
    # then 1x1 conv (bf16 MXU matmul), plus this stage's partial BN stats.
    tm, cout = y_ref.shape
    a = jnp.maximum(yp_ref[...].astype(jnp.float32) * sc_ref[...] + sh_ref[...], 0.0)
    y = jnp.dot(a.astype(jnp.bfloat16), w_ref[...],
                preferred_element_type=jnp.float32)
    y_ref[...] = y.astype(y_ref.dtype)
    ps_ref[...], pq_ref[...] = _partial_stats(y, tm, cout, m_total)


def _norm_relu_conv3x3_stats_kernel(yp_ref, sc_ref, sh_ref, w_ref,
                                    y_ref, ps_ref, pq_ref, pad_scr,
                                    *, H, W, m_total):
    # One image per grid step: normalize+ReLU the stage-1 output, zero-pad in
    # a VMEM scratch (no jnp.pad HBM round-trip), then the 3x3 conv as 9
    # shifted-window matmuls accumulated in f32 (no 9x im2col scratch and no
    # 9 copy passes through the vector-store slot).
    C = yp_ref.shape[-1]
    cout = y_ref.shape[-1]
    HW = H * W
    a = jnp.maximum(yp_ref[...].astype(jnp.float32) * sc_ref[...] + sh_ref[...], 0.0)

    # Zero only the 1-pixel halo each step (interior fully overwritten below),
    # keeping the kernel state-free so the grid axis can be megacore-'parallel'.
    zrow = jnp.zeros((1, W + 2, C), jnp.float32)
    pad_scr[0:1, :, :] = zrow
    pad_scr[H + 1:H + 2, :, :] = zrow
    zcol = jnp.zeros((H + 2, 1, C), jnp.float32)
    pad_scr[:, 0:1, :] = zcol
    pad_scr[:, W + 1:W + 2, :] = zcol
    pad_scr[1:H + 1, 1:W + 1, :] = a.reshape(H, W, C)

    acc = jnp.zeros((HW, cout), jnp.float32)
    for dh in range(3):
        for dw in range(3):
            t = dh * 3 + dw
            win = pad_scr[dh:dh + H, dw:dw + W, :].reshape(HW, C)
            acc += jnp.dot(win.astype(jnp.bfloat16), w_ref[t * C:(t + 1) * C, :],
                           preferred_element_type=jnp.float32)

    y_ref[...] = acc.astype(y_ref.dtype)
    ps_ref[...], pq_ref[...] = _partial_stats(acc, HW, cout, m_total)


def _final_conv_skip_kernel(y3_ref, sc_ref, sh_ref, xs_ref, wi_ref, bi_ref, o_ref):
    # Fused: BN3 normalize + 1x1-conv skip branch + residual add + ReLU.
    yn = y3_ref[...].astype(jnp.float32) * sc_ref[...] + sh_ref[...]
    skip = jnp.dot(xs_ref[...].astype(jnp.bfloat16), wi_ref[...],
                   preferred_element_type=jnp.float32) + bi_ref[...]
    o_ref[...] = jnp.maximum(yn + skip, 0.0)


def _final_identity_skip_kernel(y3_ref, sc_ref, sh_ref, xs_ref, o_ref):
    yn = y3_ref[...].astype(jnp.float32) * sc_ref[...] + sh_ref[...]
    o_ref[...] = jnp.maximum(yn + xs_ref[...], 0.0)


# ------------------------------ pallas_call glue -----------------------------

def _call_conv1x1_stats(x2d, w, tm):
    M, cin = x2d.shape
    cout = w.shape[1]
    nt = pl.cdiv(M, tm)
    kernel = functools.partial(_conv1x1_stats_kernel, m_total=M)
    return pl.pallas_call(
        kernel,
        grid=(nt,),
        in_specs=[pl.BlockSpec((tm, cin), lambda i: (i, 0)),
                  # TODO(synk): single-buffer / manual-DMA the constant-index
                  # weight block for large channel counts (double-buffer waste).
                  pl.BlockSpec((cin, cout), lambda i: (0, 0))],
        out_specs=(pl.BlockSpec((tm, cout), lambda i: (i, 0)),
                   pl.BlockSpec((8, cout), lambda i: (i, 0)),
                   pl.BlockSpec((8, cout), lambda i: (i, 0))),
        out_shape=(jax.ShapeDtypeStruct((M, cout), jnp.bfloat16),
                   jax.ShapeDtypeStruct((nt * 8, cout), jnp.float32),
                   jax.ShapeDtypeStruct((nt * 8, cout), jnp.float32)),
        compiler_params=_compiler_params(("parallel",)),
    )(x2d, w)


def _call_norm_relu_conv1x1_stats(yp, sc, sh, w, tm):
    M, cin = yp.shape
    cout = w.shape[1]
    nt = pl.cdiv(M, tm)
    kernel = functools.partial(_norm_relu_conv1x1_stats_kernel, m_total=M)
    return pl.pallas_call(
        kernel,
        grid=(nt,),
        in_specs=[pl.BlockSpec((tm, cin), lambda i: (i, 0)),
                  pl.BlockSpec((1, cin), lambda i: (0, 0)),
                  pl.BlockSpec((1, cin), lambda i: (0, 0)),
                  pl.BlockSpec((cin, cout), lambda i: (0, 0))],
        out_specs=(pl.BlockSpec((tm, cout), lambda i: (i, 0)),
                   pl.BlockSpec((8, cout), lambda i: (i, 0)),
                   pl.BlockSpec((8, cout), lambda i: (i, 0))),
        out_shape=(jax.ShapeDtypeStruct((M, cout), jnp.bfloat16),
                   jax.ShapeDtypeStruct((nt * 8, cout), jnp.float32),
                   jax.ShapeDtypeStruct((nt * 8, cout), jnp.float32)),
        compiler_params=_compiler_params(("parallel",)),
    )(yp, sc, sh, w)


def _call_norm_relu_conv3x3_stats(yp, sc, sh, w2flat, N, H, W):
    # TODO(synk): for large H*W, tile rows with a 1-row halo (grid=(N, H//R))
    # to bound per-step VMEM (v7x: 64 MiB) and add pipelining steps.
    HW = H * W
    C = yp.shape[1]
    cout = w2flat.shape[1]
    M = N * HW
    kernel = functools.partial(_norm_relu_conv3x3_stats_kernel,
                               H=H, W=W, m_total=M)
    return pl.pallas_call(
        kernel,
        grid=(N,),
        in_specs=[pl.BlockSpec((HW, C), lambda n: (n, 0)),
                  pl.BlockSpec((1, C), lambda n: (0, 0)),
                  pl.BlockSpec((1, C), lambda n: (0, 0)),
                  pl.BlockSpec((9 * C, cout), lambda n: (0, 0))],
        out_specs=(pl.BlockSpec((HW, cout), lambda n: (n, 0)),
                   pl.BlockSpec((8, cout), lambda n: (n, 0)),
                   pl.BlockSpec((8, cout), lambda n: (n, 0))),
        out_shape=(jax.ShapeDtypeStruct((M, cout), jnp.bfloat16),
                   jax.ShapeDtypeStruct((N * 8, cout), jnp.float32),
                   jax.ShapeDtypeStruct((N * 8, cout), jnp.float32)),
        scratch_shapes=[pltpu.VMEM((H + 2, W + 2, C), jnp.float32)],
        compiler_params=_compiler_params(("parallel",)),
    )(yp, sc, sh, w2flat)


def _call_final_conv_skip(y3, sc, sh, xs, wi, bi, tm):
    M, cout = y3.shape
    cin = xs.shape[1]
    nt = pl.cdiv(M, tm)
    return pl.pallas_call(
        _final_conv_skip_kernel,
        grid=(nt,),
        in_specs=[pl.BlockSpec((tm, cout), lambda i: (i, 0)),
                  pl.BlockSpec((1, cout), lambda i: (0, 0)),
                  pl.BlockSpec((1, cout), lambda i: (0, 0)),
                  pl.BlockSpec((tm, cin), lambda i: (i, 0)),
                  pl.BlockSpec((cin, cout), lambda i: (0, 0)),
                  pl.BlockSpec((1, cout), lambda i: (0, 0))],
        out_specs=pl.BlockSpec((tm, cout), lambda i: (i, 0)),
        out_shape=jax.ShapeDtypeStruct((M, cout), jnp.float32),
        compiler_params=_compiler_params(("parallel",)),
    )(y3, sc, sh, xs, wi, bi)


def _call_final_identity_skip(y3, sc, sh, xs, tm):
    M, cout = y3.shape
    nt = pl.cdiv(M, tm)
    return pl.pallas_call(
        _final_identity_skip_kernel,
        grid=(nt,),
        in_specs=[pl.BlockSpec((tm, cout), lambda i: (i, 0)),
                  pl.BlockSpec((1, cout), lambda i: (0, 0)),
                  pl.BlockSpec((1, cout), lambda i: (0, 0)),
                  pl.BlockSpec((tm, cout), lambda i: (i, 0))],
        out_specs=pl.BlockSpec((tm, cout), lambda i: (i, 0)),
        out_shape=jax.ShapeDtypeStruct((M, cout), jnp.float32),
        compiler_params=_compiler_params(("parallel",)),
    )(y3, sc, sh, xs)


# --------------------------- parameters & forward ----------------------------

def _iden_config(in_c, out_c):
    # Mirrors the PyTorch module exactly (the module ignores `stride` when
    # choosing the skip branch).
    if in_c == 64:
        return True, 1          # conv 1x1, stride 1
    elif in_c == out_c:
        return False, 1         # nn.Identity
    else:
        return True, 2          # conv 1x1, stride 2


def init_params(key, in_c, red_c, out_c):
    iden_is_conv, _ = _iden_config(in_c, out_c)
    ks = jax.random.split(key, 12)
    f32 = jnp.float32
    p = {
        "w1": jax.random.normal(ks[0], (in_c, red_c), f32) * 0.1,
        "b1": jax.random.normal(ks[1], (1, red_c), f32) * 0.1,
        "g1": 1.0 + 0.1 * jax.random.normal(ks[2], (1, red_c), f32),
        "be1": 0.1 * jax.random.normal(ks[3], (1, red_c), f32),
        "w2": jax.random.normal(ks[4], (3, 3, red_c, red_c), f32) * 0.1,
        "b2": jax.random.normal(ks[5], (1, red_c), f32) * 0.1,
        "g2": 1.0 + 0.1 * jax.random.normal(ks[6], (1, red_c), f32),
        "be2": 0.1 * jax.random.normal(ks[7], (1, red_c), f32),
        "w3": jax.random.normal(ks[8], (red_c, out_c), f32) * 0.1,
        "b3": jax.random.normal(ks[9], (1, out_c), f32) * 0.1,
        "g3": 1.0 + 0.1 * jax.random.normal(ks[10], (1, out_c), f32),
        "be3": 0.1 * jax.random.normal(ks[11], (1, out_c), f32),
    }
    if iden_is_conv:
        ki = jax.random.split(jax.random.fold_in(key, 99), 2)
        p["wi"] = jax.random.normal(ki[0], (in_c, out_c), f32) * 0.1
        p["bi"] = jax.random.normal(ki[1], (1, out_c), f32) * 0.1
    return p


def res_block_forward(x_nchw, p, *, in_c, red_c, out_c, stride=1):
    # NCHW (PyTorch) -> NHWC; channels zero-padded to a lane multiple (128) so
    # every matmul output / store is lane-dense.
    # TODO(synk): fold NCHW->NHWC transpose + stride-2 selection into the
    # stage-1 / skip BlockSpec index_maps instead of wrapper-side slices.
    x = jnp.transpose(x_nchw, (0, 2, 3, 1)).astype(jnp.float32)
    N, H, W, _ = x.shape
    cin_p = _round_up(in_c, LANE)
    cr_p = _round_up(red_c, LANE)
    cout_p = _round_up(out_c, LANE)
    x_p = _pad_last(x, cin_p)

    # Padded parameters (pad channels carry zero weight/gamma/beta).  Conv
    # biases b1/b2/b3 are cancelled exactly by training-mode BN -> not used.
    bf16 = jnp.bfloat16
    w1 = _pad_matrix(p["w1"], cin_p, cr_p).astype(bf16)
    g1, be1 = _pad_last(p["g1"], cr_p), _pad_last(p["be1"], cr_p)
    w2 = jnp.pad(p["w2"], ((0, 0), (0, 0), (0, cr_p - red_c), (0, cr_p - red_c)))
    w2 = w2.reshape(9 * cr_p, cr_p).astype(bf16)   # rows ordered (dh, dw, cin)
    g2, be2 = _pad_last(p["g2"], cr_p), _pad_last(p["be2"], cr_p)
    w3 = _pad_matrix(p["w3"], cr_p, cout_p).astype(bf16)
    g3, be3 = _pad_last(p["g3"], cout_p), _pad_last(p["be3"], cout_p)

    # --- stage 1: 1x1 conv (stride) + BN1 partial statistics -----------------
    xs = x_p[:, ::stride, ::stride, :]        # no-op for stride=1
    Ho, Wo = xs.shape[1], xs.shape[2]
    M = N * Ho * Wo
    tm = _pick_tile_m(M)
    y1, ps1, pq1 = _call_conv1x1_stats(xs.reshape(M, cin_p), w1, tm)
    sc1, sh1 = _bn_scale_shift(ps1, pq1, g1, be1, M)

    # --- stage 2: fused BN1+ReLU + 3x3 conv (in-kernel pad, 9 shifted dots) ---
    assert (Ho * Wo) % 8 == 0, "3x3 stage expects Ho*Wo % 8 == 0"
    y2, ps2, pq2 = _call_norm_relu_conv3x3_stats(y1, sc1, sh1, w2, N, Ho, Wo)
    sc2, sh2 = _bn_scale_shift(ps2, pq2, g2, be2, M)

    # --- stage 3: fused BN2+ReLU + 1x1 conv + BN3 partial stats ---------------
    y3, ps3, pq3 = _call_norm_relu_conv1x1_stats(y2, sc2, sh2, w3, tm)
    sc3, sh3 = _bn_scale_shift(ps3, pq3, g3, be3, M)

    # --- skip branch fused with final BN3 + residual add + ReLU ---------------
    iden_is_conv, si = _iden_config(in_c, out_c)
    if iden_is_conv:
        xi = x_p[:, ::si, ::si, :]
        assert xi.shape[1:3] == (Ho, Wo), "skip/main spatial mismatch (as in PyTorch)"
        wi = _pad_matrix(p["wi"], cin_p, cout_p).astype(bf16)
        bi = _pad_last(p["bi"], cout_p)
        out = _call_final_conv_skip(y3, sc3, sh3, xi.reshape(M, cin_p), wi, bi, tm)
    else:
        assert (H, W) == (Ho, Wo) and cin_p == cout_p, \
            "identity skip requires matching spatial/channels (as in PyTorch)"
        out = _call_final_identity_skip(y3, sc3, sh3, x_p.reshape(M, cout_p), tm)

    out = out.reshape(N, Ho, Wo, cout_p)[..., :out_c]
    return jnp.transpose(out, (0, 3, 1, 2))   # back to NCHW


# ------------------------------ pure-JAX reference ---------------------------

def ref_forward(x_nchw, p, *, in_c, red_c, out_c, stride=1):
    x = jnp.transpose(x_nchw, (0, 2, 3, 1)).astype(jnp.float32)

    def bn(y, g, b):
        mean = y.mean(axis=(0, 1, 2), keepdims=True)
        var = ((y - mean) ** 2).mean(axis=(0, 1, 2), keepdims=True)
        return (y - mean) / jnp.sqrt(var + EPS) * g.reshape(1, 1, 1, -1) + b.reshape(1, 1, 1, -1)

    y = jnp.einsum('nhwc,cr->nhwr', x[:, ::stride, ::stride, :], p["w1"]) + p["b1"].reshape(1, 1, 1, -1)
    y = jax.nn.relu(bn(y, p["g1"], p["be1"]))
    y = lax.conv_general_dilated(y, p["w2"], (1, 1), 'SAME',
                                 dimension_numbers=('NHWC', 'HWIO', 'NHWC'))
    y = y + p["b2"].reshape(1, 1, 1, -1)
    y = jax.nn.relu(bn(y, p["g2"], p["be2"]))
    y = jnp.einsum('nhwc,co->nhwo', y, p["w3"]) + p["b3"].reshape(1, 1, 1, -1)
    y = bn(y, p["g3"], p["be3"])

    iden_is_conv, si = _iden_config(in_c, out_c)
    if iden_is_conv:
        skip = jnp.einsum('nhwc,co->nhwo', x[:, ::si, ::si, :], p["wi"]) + p["bi"].reshape(1, 1, 1, -1)
    else:
        skip = x
    out = jax.nn.relu(y + skip)
    return out.transpose(0, 3, 1, 2)


# ------------------------------------ main -----------------------------------

if __name__ == "__main__":
    key = jax.random.PRNGKey(0)

    configs = [
        # (in_c, red_c, out_c, stride, N, H, W)  -> identity-skip path
        (8, 4, 8, 1, 2, 16, 16),
        # in_channels == 64 -> 1x1 conv (stride 1) skip path
        (64, 16, 32, 1, 2, 8, 8),
    ]

    for idx, (in_c, red_c, out_c, stride, N, H, W) in enumerate(configs):
        kx, kp = jax.random.split(jax.random.fold_in(key, idx))
        x = jax.random.normal(kx, (N, in_c, H, W), jnp.float32)
        params = init_params(kp, in_c, red_c, out_c)

        out = res_block_forward(x, params, in_c=in_c, red_c=red_c,
                                out_c=out_c, stride=stride)
        out = jax.block_until_ready(out)
        ref = ref_forward(x, params, in_c=in_c, red_c=red_c,
                          out_c=out_c, stride=stride)

        assert out.shape == ref.shape, (out.shape, ref.shape)
        # bf16 inter-stage activations / MXU operands vs. f32 reference ->
        # tolerance reflects bf16 rounding through three matmul stages.
        assert jnp.allclose(out, ref, rtol=1e-1, atol=5e-2), \
            f"config {idx}: max abs err {jnp.max(jnp.abs(out - ref))}"

    print("KERNEL_OK")
</pallas_src>

<mosaic_0001>
module attributes {stable_mosaic.version = 11 : i64} {
  func.func @_conv1x1_stats_kernel(%arg0: i32, %arg1: memref<512x128xf32, #tpu.memory_space<vmem>>, %arg2: memref<128x128xbf16, #tpu.memory_space<vmem>>, %arg3: memref<512x128xbf16, #tpu.memory_space<vmem>>, %arg4: memref<8x128xf32, #tpu.memory_space<vmem>>, %arg5: memref<8x128xf32, #tpu.memory_space<vmem>>) attributes {dimension_semantics = [#tpu.dimension_semantics<parallel>], iteration_bounds = array<i64: 1>, scalar_prefetch = 0 : i64, scratch_operands = 0 : i64, tpu.core_type = #tpu.core_type<tc>, window_params = [{transform_indices = @transform_0, window_bounds = array<i64: 512, 128>}, {pipeline_mode = #tpu.pipeline_mode<synchronous>, transform_indices = @transform_1, window_bounds = array<i64: 128, 128>}, {transform_indices = @transform_2, window_bounds = array<i64: 512, 128>}, {transform_indices = @transform_3, window_bounds = array<i64: 8, 128>}, {transform_indices = @transform_4, window_bounds = array<i64: 8, 128>}]} {
    %c0 = arith.constant 0 : index
    %c0_0 = arith.constant 0 : index
    %0 = vector.load %arg1[%c0, %c0_0] : memref<512x128xf32, #tpu.memory_space<vmem>>, vector<512x128xf32>
    %1 = arith.truncf %0 : vector<512x128xf32> to vector<512x128xbf16>
    %c0_1 = arith.constant 0 : index
    %c0_2 = arith.constant 0 : index
    %2 = vector.load %arg2[%c0_1, %c0_2] : memref<128x128xbf16, #tpu.memory_space<vmem>>, vector<128x128xbf16>
    %cst = arith.constant dense<0.000000e+00> : vector<512x128xf32>
    %3 = tpu.matmul %1, %2, %cst {dimension_numbers = #tpu.dot_dimension_numbers<[1], [0], [0], [1], [0, 0, 1, 1], [], []>} : vector<512x128xbf16>, vector<128x128xbf16>, vector<512x128xf32> -> vector<512x128xf32>
    %4 = arith.truncf %3 : vector<512x128xf32> to vector<512x128xbf16>
    %c0_3 = arith.constant 0 : index
    %c0_4 = arith.constant 0 : index
    %5 = vector.load %arg3[%c0_3, %c0_4] : memref<512x128xbf16, #tpu.memory_space<vmem>>, vector<512x128xbf16>
    tpu.vector_store %arg3[%c0_3, %c0_4], %4 {strides = array<i32>} : memref<512x128xbf16, #tpu.memory_space<vmem>>, vector<512x128xbf16>,
    %6 = tpu.iota {dimensions = array<i32: 0>} : vector<512x1xi32>
    %c512_i32 = arith.constant 512 : i32
    %7 = arith.muli %arg0, %c512_i32 : i32
    %8 = vector.broadcast %7 : i32 to vector<512x1xi32>
    %9 = arith.addi %6, %8 : vector<512x1xi32>
    %c512_i32_5 = arith.constant 512 : i32
    %10 = vector.broadcast %c512_i32_5 : i32 to vector<512x1xi32>
    %11 = arith.cmpi slt, %9, %10 : vector<512x1xi32>
    %cst_6 = arith.constant 0.000000e+00 : f32
    %12 = vector.shape_cast %11 : vector<512x1xi1> to vector<512x1xi1>
    %13 = vector.broadcast %12 : vector<512x1xi1> to vector<512x128xi1>
    %14 = vector.broadcast %cst_6 : f32 to vector<512x128xf32>
    %15 = arith.select %13, %3, %14 : vector<512x128xi1>, vector<512x128xf32>
    %16 = vector.shape_cast %15 : vector<512x128xf32> to vector<64x8x128xf32>
    %cst_7 = arith.constant dense<0.000000e+00> : vector<8x128xf32>
    %17 = vector.multi_reduction <add>, %16, %cst_7 [0] : vector<64x8x128xf32> to vector<8x128xf32>
    %18 = arith.mulf %15, %15 : vector<512x128xf32>
    %19 = vector.shape_cast %18 : vector<512x128xf32> to vector<64x8x128xf32>
    %cst_8 = arith.constant dense<0.000000e+00> : vector<8x128xf32>
    %20 = vector.multi_reduction <add>, %19, %cst_8 [0] : vector<64x8x128xf32> to vector<8x128xf32>
    %c0_9 = arith.constant 0 : index
    %c0_10 = arith.constant 0 : index
    %21 = vector.load %arg4[%c0_9, %c0_10] : memref<8x128xf32, #tpu.memory_space<vmem>>, vector<8x128xf32>
    tpu.vector_store %arg4[%c0_9, %c0_10], %17 {strides = array<i32>} : memref<8x128xf32, #tpu.memory_space<vmem>>, vector<8x128xf32>,
    %c0_11 = arith.constant 0 : index
    %c0_12 = arith.constant 0 : index
    %22 = vector.load %arg5[%c0_11, %c0_12] : memref<8x128xf32, #tpu.memory_space<vmem>>, vector<8x128xf32>
    tpu.vector_store %arg5[%c0_11, %c0_12], %20 {strides = array<i32>} : memref<8x128xf32, #tpu.memory_space<vmem>>, vector<8x128xf32>,
    return
  }
  func.func @transform_0(%arg0: i32) -> (i32, i32) {
    %c0_i32 = arith.constant 0 : i32
    %c0_i32_0 = arith.constant 0 : i32
    return %arg0, %c0_i32 : i32, i32
  }
  func.func @transform_1(%arg0: i32) -> (i32, i32) {
    %c0_i32 = arith.constant 0 : i32
    %c0_i32_0 = arith.constant 0 : i32
    %c0_i32_1 = arith.constant 0 : i32
    return %c0_i32, %c0_i32_0 : i32, i32
  }
  func.func @transform_2(%arg0: i32) -> (i32, i32) {
    %c0_i32 = arith.constant 0 : i32
    %c0_i32_0 = arith.constant 0 : i32
    return %arg0, %c0_i32 : i32, i32
  }
  func.func @transform_3(%arg0: i32) -> (i32, i32) {
    %c0_i32 = arith.constant 0 : i32
    %c0_i32_0 = arith.constant 0 : i32
    return %arg0, %c0_i32 : i32, i32
  }
  func.func @transform_4(%arg0: i32) -> (i32, i32) {
    %c0_i32 = arith.constant 0 : i32
    %c0_i32_0 = arith.constant 0 : i32
    return %arg0, %c0_i32 : i32, i32
  }
}

</mosaic_0001>

<bundles_post_ra>
// kernel: tpu_custom_call.1
= control target key start
LH: loop header
LB: loop body
LE: loop exit
PB: predicated region body
PF: predicated region fallthrough
CT: control target
= control target key end

     0   :  { %10 = vsyncpa [#allocation3], 0  ;;  %s2328_s0 = inlined_call_operand.hbm [shape: f32[512,128], index: 0, kind: input, shape index: {}]   ;;  %s2329_s1 = inlined_call_operand.hbm [shape: bf16[128,128], index: 1, kind: input, shape index: {}]   ;;  %s2330_s2 = inlined_call_operand.hbm [shape: bf16[512,128], index: 2, kind: output, shape index: {0}]   ;;  %s2331_s3 = inlined_call_operand.hbm [shape: f32[8,128], index: 3, kind: output, shape index: {1}]   ;;  %s2332_s4 = inlined_call_operand.hbm [shape: f32[8,128], index: 4, kind: output, shape index: {2}]  }
   0x1   :  { %11 = vsyncpa [#allocation6], 0 }
   0x2   :  { %12 = vsyncpa [#allocation4], 0 }
   0x3   :  { %13 = vsyncpa [#allocation9], 0  ;;  %s2036_s15 = smov [#allocation2]   ;;  %s1918_s19 = scalar_lea.hbm %s2328_s0, 8192 }
   0x4   :  { %s19_s16 = sshll.u32 %s2036_s15, 4  ;;  %p1919_p0 = scmp.ne.s32.totalorder %s2328_s0, %s1918_s19  ;;  %s20_s16 = int_to_ptr.vmem [resolvable:$true] %s19_s16 }
   0x5   :  { %p1922_p1 = scmp.lt.u32.totalorder %s1918_s19, %s2328_s0 }
   0x7   :  { %p1924_p2 = pnand %p1922_p1, %p1919_p0 }
   0x9   :  { %1927 = shalt.err (!%p1924_p2)
}
   0xa   :  { %s1928_s24 = scalar_lea.vmem %s20_s16, 8192  ;;  %p1933_p4 = scmp.lt.s32.totalorder %s20_s16, %s20_s16 }
   0xb   :  { %p1929_p3 = scmp.ne.s32.totalorder %s20_s16, %s1928_s24  ;;  %p1934_p5 = scmp.lt.s32.totalorder %s1928_s24, %s1928_s24 }
   0xd   :  { %p1935_p6 = por %p1934_p5, %p1933_p4 }
   0xf   :  { %p1936_p7 = pnand %p1935_p6, %p1929_p3 }
  0x11   :  { %1939 = shalt.err (!%p1936_p7)
}
  0x12   :  { %s2037_s25 = smov 128   ;;  %s2038_s26 = smov 8  }
  0x13   :  { %25 = dma.hbm_to_vmem [thread:$0]  %s2328_s0, 8192, %s20_s16, [#allocation3], %s2037_s25, %s2037_s25, %s2038_s26  }
  0x14   :  { %s2039_s29 = smov [#allocation5]   ;;  %s1940_s7 = scalar_lea.hbm %s2329_s1, 1024 }
  0x15   :  { %s31_s30 = sshll.u32 %s2039_s29, 4  ;;  %p1941_p8 = scmp.ne.s32.totalorder %s2329_s1, %s1940_s7  ;;  %s32_s30 = int_to_ptr.vmem [resolvable:$true] %s31_s30 }
  0x16   :  { %p1944_p9 = scmp.lt.u32.totalorder %s1940_s7, %s2329_s1 }
  0x18   :  { %p1946_p10 = pnand %p1944_p9, %p1941_p8 }
  0x1a   :  { %1949 = shalt.err (!%p1946_p10)
}
  0x1b   :  { %s1950_s12 = scalar_lea.vmem %s32_s30, 1024  ;;  %p1955_p12 = scmp.lt.s32.totalorder %s32_s30, %s32_s30 }
  0x1c   :  { %p1951_p11 = scmp.ne.s32.totalorder %s32_s30, %s1950_s12  ;;  %p1956_p13 = scmp.lt.s32.totalorder %s1950_s12, %s1950_s12 }
  0x1e   :  { %p1957_p0 = por %p1956_p13, %p1955_p12 }
  0x20   :  { %p1958_p1 = pnand %p1957_p0, %p1951_p11 }
  0x22   :  { %1961 = shalt.err (!%p1958_p1)
}
  0x23   :  { %s2040_s0 = smov 64   ;;  %s2041_s13 = smov 4  }
  0x24   :  { %37 = dma.hbm_to_vmem [thread:$0]  %s2329_s1, 1024, %s32_s30, [#allocation6], %s2040_s0, %s2040_s0, %s2041_s13  }
  0x25   :  { %2028 = dma.done.wait [#allocation3], 8192  }
  0x26   :  { %2029 = vsyncadd [#allocation3], 4294959104 }
  0x27   :  { %2030 = dma.done.wait [#allocation6], 1024  }
  0x28   :  { %2031 = vsyncadd [#allocation6], 4294966272  ;;  %v1910_v0 = vld [vmem:[#allocation5] sm:$0xff]   ;;  %v1911_v1 = vld [vmem:[#allocation5 + $0x8] sm:$0xff]   ;;  %s2042_s1 = smov [#allocation7]  }
  0x29   :  { %1805 = vmatprep.subr.bf16.mxu0 %v1910_v0  ;;  %1885 = vmatprep.subr.bf16.mxu1 %v1910_v0  ;;  %v1912_v2 = vld [vmem:[#allocation5 + $0x10] sm:$0xff]   ;;  %v1913_v3 = vld [vmem:[#allocation5 + $0x18] sm:$0xff]   ;;  %v45_v4 = vld [vmem:[#allocation2] sm:$0xff]  ;;  %s1398_s16 = sshll.u32 %s2042_s1, 4  ;;  %s1399_s16 = int_to_ptr.vmem [resolvable:$true] %s1398_s16 }
  0x2a   :  { %1806 = vmatpush3.bf16.msra.mxu0 %v1910_v0  ;;  %1893 = vmatpush3.bf16.msra.mxu1 %v1910_v0  ;;  %v46_v5 = vld [vmem:[#allocation2 + $0x8] sm:$0xff]  ;;  %v1914_v7 = vld [vmem:[#allocation5 + $0x20] sm:$0xff]   ;;  %v1916_v11 = vld [vmem:[#allocation5 + $0x30] sm:$0xff]   ;;  %s1962_s17 = scalar_lea.vmem %s1399_s16, 4096  ;;  %p1967_p3 = scmp.lt.s32.totalorder %s1399_s16, %s1399_s16 }
  0x2b   :  { %1807 = vmatprep.subr.bf16.mxu0 %v1911_v1  ;;  %1886 = vmatprep.subr.bf16.mxu1 %v1911_v1  ;;  %v109_v6 = vpack.c.bf16 %v46_v5, %v45_v4  ;;  %v1915_v8 = vld [vmem:[#allocation5 + $0x28] sm:$0xff]   ;;  %v77_v9 = vld [vmem:[#allocation2 + $0x100] sm:$0xff]  ;;  %v1917_v13 = vld [vmem:[#allocation5 + $0x38] sm:$0xff]   ;;  %p1963_p2 = scmp.ne.s32.totalorder %s1399_s16, %s1962_s17  ;;  %p1968_p4 = scmp.lt.s32.totalorder %s1962_s17, %s1962_s17 }
  0x2c   :  { %v78_v10 = vld [vmem:[#allocation2 + $0x108] sm:$0xff]  ;;  %v47_v14 = vld [vmem:[#allocation2 + $0x10] sm:$0xff]  ;;  %v48_v15 = vld [vmem:[#allocation2 + $0x18] sm:$0xff] }
  0x2d   :  { %1821 = vmatprep.mubr.bf16.mxu0 %v109_v6  ;;  %v125_v12 = vpack.c.bf16 %v78_v10, %v77_v9  ;;  %v49_v16 = vld [vmem:[#allocation2 + $0x20] sm:$0xff]  ;;  %v50_v17 = vld [vmem:[#allocation2 + $0x28] sm:$0xff]  ;;  %v79_v18 = vld [vmem:[#allocation2 + $0x110] sm:$0xff]  ;;  %v110_v22 = vpack.c.bf16 %v48_v15, %v47_v14  ;;  %p1969_p5 = por %p1968_p4, %p1967_p3 }
  0x2e   :  { %1808 = vmatpush3.bf16.msra.mxu0 %v1911_v1  ;;  %1894 = vmatpush3.bf16.msra.mxu1 %v1911_v1  ;;  %v80_v19 = vld [vmem:[#allocation2 + $0x118] sm:$0xff]  ;;  %v81_v20 = vld [vmem:[#allocation2 + $0x120] sm:$0xff]  ;;  %v82_v21 = vld [vmem:[#allocation2 + $0x128] sm:$0xff]  ;;  %v111_v23 = vpack.c.bf16 %v50_v17, %v49_v16 }
  0x2f   :  { %1809 = vmatprep.subr.bf16.mxu0 %v1912_v2  ;;  %1887 = vmatprep.subr.bf16.mxu1 %v1912_v2  ;;  %v126_v24 = vpack.c.bf16 %v80_v19, %v79_v18  ;;  %v127_v25 = vpack.c.bf16 %v82_v21, %v81_v20  ;;  %v51_v26 = vld [vmem:[#allocation2 + $0x30] sm:$0xff]  ;;  %v52_v27 = vld [vmem:[#allocation2 + $0x38] sm:$0xff]  ;;  %v53_v28 = vld [vmem:[#allocation2 + $0x40] sm:$0xff]  ;;  %p1970_p6 = pnand %p1969_p5, %p1963_p2 }
  0x30   :  { %1853 = vmatprep.mubr.bf16.mxu1 %v125_v12  ;;  %v54_v29 = vld [vmem:[#allocation2 + $0x48] sm:$0xff]  ;;  %v83_v30 = vld [vmem:[#allocation2 + $0x130] sm:$0xff]  ;;  %v84_v31 = vld [vmem:[#allocation2 + $0x138] sm:$0xff]  ;;  %v112_v34 = vpack.c.bf16 %v52_v27, %v51_v26 }
  0x31   :  { %v85_v32 = vld [vmem:[#allocation2 + $0x140] sm:$0xff]  ;;  %v86_v33 = vld [vmem:[#allocation2 + $0x148] sm:$0xff]  ;;  %v113_v35 = vpack.c.bf16 %v54_v29, %v53_v28  ;;  %v128_v36 = vpack.c.bf16 %v84_v31, %v83_v30  ;;  %v55_v38 = vld [vmem:[#allocation2 + $0x50] sm:$0xff] }
  0x32   :  { %1810 = vmatpush3.bf16.msra.mxu0 %v1912_v2  ;;  %1895 = vmatpush3.bf16.msra.mxu1 %v1912_v2  ;;  %v129_v37 = vpack.c.bf16 %v86_v33, %v85_v32  ;;  %v56_v39 = vld [vmem:[#allocation2 + $0x58] sm:$0xff]  ;;  %v57_v40 = vld [vmem:[#allocation2 + $0x60] sm:$0xff]  ;;  %v58_v41 = vld [vmem:[#allocation2 + $0x68] sm:$0xff] }
  0x33   :  { %1811 = vmatprep.subr.bf16.mxu0 %v1913_v3  ;;  %1888 = vmatprep.subr.bf16.mxu1 %v1913_v3  ;;  %v87_v42 = vld [vmem:[#allocation2 + $0x150] sm:$0xff]  ;;  %v88_v43 = vld [vmem:[#allocation2 + $0x158] sm:$0xff]  ;;  %v89_v44 = vld [vmem:[#allocation2 + $0x160] sm:$0xff]  ;;  %v114_v46 = vpack.c.bf16 %v56_v39, %v55_v38  ;;  %v115_v47 = vpack.c.bf16 %v58_v41, %v57_v40 }
  0x34   :  { %v90_v45 = vld [vmem:[#allocation2 + $0x168] sm:$0xff]  ;;  %v130_v48 = vpack.c.bf16 %v88_v43, %v87_v42  ;;  %v59_v50 = vld [vmem:[#allocation2 + $0x70] sm:$0xff]  ;;  %v60_v51 = vld [vmem:[#allocation2 + $0x78] sm:$0xff] }
  0x35   :  { %v131_v49 = vpack.c.bf16 %v90_v45, %v89_v44  ;;  %v61_v52 = vld [vmem:[#allocation2 + $0x80] sm:$0xff]  ;;  %v62_v53 = vld [vmem:[#allocation2 + $0x88] sm:$0xff]  ;;  %v91_v54 = vld [vmem:[#allocation2 + $0x170] sm:$0xff]  ;;  %v116_v58 = vpack.c.bf16 %v60_v51, %v59_v50 }
  0x36   :  { %1812 = vmatpush3.bf16.msra.mxu0 %v1913_v3  ;;  %1896 = vmatpush3.bf16.msra.mxu1 %v1913_v3  ;;  %v92_v55 = vld [vmem:[#allocation2 + $0x178] sm:$0xff]  ;;  %v93_v56 = vld [vmem:[#allocation2 + $0x180] sm:$0xff]  ;;  %v94_v57 = vld [vmem:[#allocation2 + $0x188] sm:$0xff]  ;;  %v117_v59 = vpack.c.bf16 %v62_v53, %v61_v52 }
  0x37   :  { %1813 = vmatprep.subr.bf16.mxu0 %v1914_v7  ;;  %1889 = vmatprep.subr.bf16.mxu1 %v1914_v7  ;;  %v132_v60 = vpack.c.bf16 %v92_v55, %v91_v54  ;;  %v133_v61 = vpack.c.bf16 %v94_v57, %v93_v56  ;;  %v63_v62 = vld [vmem:[#allocation2 + $0x90] sm:$0xff]  ;;  %v64_v63 = vld [vmem:[#allocation2 + $0x98] sm:$0xff]  ;;  %v65_v0 = vld [vmem:[#allocation2 + $0xa0] sm:$0xff] }
  0x38   :  { %v66_v1 = vld [vmem:[#allocation2 + $0xa8] sm:$0xff]  ;;  %v95_v2 = vld [vmem:[#allocation2 + $0x190] sm:$0xff]  ;;  %v96_v3 = vld [vmem:[#allocation2 + $0x198] sm:$0xff]  ;;  %v118_v6 = vpack.c.bf16 %v64_v63, %v63_v62 }
  0x39   :  { %v97_v4 = vld [vmem:[#allocation2 + $0x1a0] sm:$0xff]  ;;  %v98_v5 = vld [vmem:[#allocation2 + $0x1a8] sm:$0xff]  ;;  %v67_v10 = vld [vmem:[#allocation2 + $0xb0] sm:$0xff] }
  0x3a   :  { %1814 = vmatpush3.bf16.msra.mxu0 %v1914_v7  ;;  %1897 = vmatpush3.bf16.msra.mxu1 %v1914_v7  ;;  %v119_v7 = vpack.c.bf16 %v66_v1, %v65_v0  ;;  %v135_v9 = vpack.c.bf16 %v98_v5, %v97_v4  ;;  %v69_v12 = vld [vmem:[#allocation2 + $0xc0] sm:$0xff]  ;;  %v99_v14 = vld [vmem:[#allocation2 + $0x1b0] sm:$0xff]  ;;  %v100_v15 = vld [vmem:[#allocation2 + $0x1b8] sm:$0xff] }
  0x3b   :  { %1815 = vmatprep.subr.bf16.mxu0 %v1915_v8  ;;  %1890 = vmatprep.subr.bf16.mxu1 %v1915_v8  ;;  %v101_v16 = vld [vmem:[#allocation2 + $0x1c0] sm:$0xff]  ;;  %v102_v17 = vld [vmem:[#allocation2 + $0x1c8] sm:$0xff]  ;;  %v136_v20 = vpack.c.bf16 %v100_v15, %v99_v14  ;;  %v103_v26 = vld [vmem:[#allocation2 + $0x1d0] sm:$0xff] }
  0x3c   :  { %v137_v21 = vpack.c.bf16 %v102_v17, %v101_v16  ;;  %v104_v27 = vld [vmem:[#allocation2 + $0x1d8] sm:$0xff]  ;;  %v105_v28 = vld [vmem:[#allocation2 + $0x1e0] sm:$0xff]  ;;  %v106_v29 = vld [vmem:[#allocation2 + $0x1e8] sm:$0xff] }
  0x3d   :  { %v138_v32 = vpack.c.bf16 %v104_v27, %v103_v26  ;;  %v139_v33 = vpack.c.bf16 %v106_v29, %v105_v28 }
  0x3e   :  { %1816 = vmatpush3.bf16.msra.mxu0 %v1915_v8  ;;  %1898 = vmatpush3.bf16.msra.mxu1 %v1915_v8  ;;  %v134_v8 = vpack.c.bf16 %v96_v3, %v95_v2 }
  0x3f   :  { %1817 = vmatprep.subr.bf16.mxu0 %v1916_v11  ;;  %1891 = vmatprep.subr.bf16.mxu1 %v1916_v11 }
  0x42   :  { %1818 = vmatpush3.bf16.msra.mxu0 %v1916_v11  ;;  %1899 = vmatpush3.bf16.msra.mxu1 %v1916_v11  ;;  %v68_v11 = vld [vmem:[#allocation2 + $0xb8] sm:$0xff] }
  0x43   :  { %1819 = vmatprep.subr.bf16.mxu0 %v1917_v13  ;;  %1892 = vmatprep.subr.bf16.mxu1 %v1917_v13  ;;  %v120_v18 = vpack.c.bf16 %v68_v11, %v67_v10 }
  0x46   :  { %1820 = vmatpush3.bf16.msra.mxu0 %v1917_v13  ;;  %1900 = vmatpush3.bf16.msra.mxu1 %v1917_v13  ;;  %v70_v13 = vld [vmem:[#allocation2 + $0xc8] sm:$0xff] }
  0x47   :  { %v121_v19 = vpack.c.bf16 %v70_v13, %v69_v12 }
  0x49   :  { %1822 = vmatmul.mubr.bf16.vlgmr.msra.gmra.mrb[0].mxu0 %v110_v22  ;;  %1854 = vmatmul.mubr.bf16.vlgmr.msra.gmra.mrb[0].mxu1 %v126_v24  ;;  %v71_v22 = vld [vmem:[#allocation2 + $0xd0] sm:$0xff]  ;;  %v73_v24 = vld [vmem:[#allocation2 + $0xe0] sm:$0xff] }
  0x4a   :  { %1825 = vmatprep.mubr.bf16.mxu0 %v111_v23  ;;  %1857 = vmatprep.mubr.bf16.mxu1 %v127_v25  ;;  %v72_v23 = vld [vmem:[#allocation2 + $0xd8] sm:$0xff]  ;;  %v74_v25 = vld [vmem:[#allocation2 + $0xe8] sm:$0xff] }
  0x4b   :  { %v122_v30 = vpack.c.bf16 %v72_v23, %v71_v22  ;;  %v123_v31 = vpack.c.bf16 %v74_v25, %v73_v24 }
  0x51   :  { %1826 = vmatmul.mubr.bf16.gmra.mrb[4].mxu0 %v112_v34  ;;  %1858 = vmatmul.mubr.bf16.gmra.mrb[4].mxu1 %v128_v36  ;;  %v75_v34 = vld [vmem:[#allocation2 + $0xf0] sm:$0xff] }
  0x52   :  { %1829 = vmatprep.mubr.bf16.mxu0 %v113_v35  ;;  %1861 = vmatprep.mubr.bf16.mxu1 %v129_v37  ;;  %v76_v35 = vld [vmem:[#allocation2 + $0xf8] sm:$0xff]  ;;  %v107_v36 = vld [vmem:[#allocation2 + $0x1f0] sm:$0xff] }
  0x53   :  { %v108_v37 = vld [vmem:[#allocation2 + $0x1f8] sm:$0xff]  ;;  %v124_v38 = vpack.c.bf16 %v76_v35, %v75_v34 }
  0x54   :  { %v140_v39 = vpack.c.bf16 %v108_v37, %v107_v36 }
  0x59   :  { %1830 = vmatmul.mubr.bf16.gmra.mrb[8].mxu0 %v114_v46  ;;  %1862 = vmatmul.mubr.bf16.gmra.mrb[8].mxu1 %v130_v48 }
  0x5a   :  { %1833 = vmatprep.mubr.bf16.mxu0 %v115_v47  ;;  %1865 = vmatprep.mubr.bf16.mxu1 %v131_v49 }
  0x61   :  { %1834 = vmatmul.mubr.bf16.gmra.mrb[12].mxu0 %v116_v58  ;;  %1866 = vmatmul.mubr.bf16.gmra.mrb[12].mxu1 %v132_v60 }
  0x62   :  { %1837 = vmatprep.mubr.bf16.mxu0 %v117_v59  ;;  %1869 = vmatprep.mubr.bf16.mxu1 %v133_v61 }
  0x69   :  { %1838 = vmatmul.mubr.bf16.gmra.mrb[16].mxu0 %v118_v6  ;;  %1870 = vmatmul.mubr.bf16.gmra.mrb[16].mxu1 %v134_v8 }
  0x6a   :  { %1841 = vmatprep.mubr.bf16.mxu0 %v119_v7  ;;  %1873 = vmatprep.mubr.bf16.mxu1 %v135_v9 }
  0x71   :  { %1842 = vmatmul.mubr.bf16.gmra.mrb[20].mxu0 %v120_v18  ;;  %1874 = vmatmul.mubr.bf16.gmra.mrb[20].mxu1 %v136_v20 }
  0x72   :  { %1845 = vmatprep.mubr.bf16.mxu0 %v121_v19  ;;  %1877 = vmatprep.mubr.bf16.mxu1 %v137_v21 }
  0x79   :  { %1846 = vmatmul.mubr.bf16.gmra.mrb[24].mxu0 %v122_v30  ;;  %1878 = vmatmul.mubr.bf16.gmra.mrb[24].mxu1 %v138_v32 }
  0x7a   :  { %1849 = vmatprep.mubr.bf16.mxu0 %v123_v31  ;;  %1881 = vmatprep.mubr.bf16.mxu1 %v139_v33 }
  0x81   :  { %1850 = vmatmul.mubr.bf16.gmra.mrb[28].mxu0 %v124_v38  ;;  %1882 = vmatmul.mubr.bf16.gmra.mrb[28].mxu1 %v140_v39 }
 0x11c   :  { %v1823_v40 = vpop.f32.mrb[0].mxu0  ;;  %v2097_v42 = vpop.f32.mrb[0].mxu1 }
 0x11d   :  { %v239_v41 = vpop.f32.mrb[1].mxu0  ;;  %v2099_v44 = vpop.f32.mrb[1].mxu1  ;;  %v1266_v55 = vmul.f32 %v1823_v40, %v1823_v40 }
 0x11e   :  { %v1824_v43 = vpop.f32.mrb[2].mxu0  ;;  %v1264_v45 = vmul.f32 %v239_v41, %v239_v41  ;;  %v2101_v48 = vpop.f32.mrb[2].mxu1 }
 0x11f   :  { %v1582_v46 = vpack.c.bf16 %v1824_v43, %v1823_v40  ;;  %v242_v47 = vpop.f32.mrb[3].mxu0  ;;  %v1662_v52 = vpack.c.bf16 %v2101_v48, %v2097_v42  ;;  %v2105_v53 = vpop.f32.mrb[3].mxu1  ;;  %v1267_v58 = vmul.f32 %v1824_v43, %v1824_v43 }
 0x120   :  { %v1577_v49 = vpack.c.bf16 %v242_v47, %v239_v41  ;;  %v1201_v50 = vadd.f32 %v242_v47, %v239_v41  ;;  %v1265_v51 = vmul.f32 %v242_v47, %v242_v47  ;;  %v1657_v54 = vpack.c.bf16 %v2105_v53, %v2099_v44 }
 0x121   :  { %1734 = vst [vmem:[#allocation7 + $0x8] sm:$0xff] %v1582_v46   ;;  %1750 = vst [vmem:[#allocation7 + $0x88] sm:$0xff] %v1662_v52  }
 0x122   :  { %1578 = vst [vmem:[#allocation7] sm:$0xff] %v1577_v49   ;;  %v1202_v56 = vadd.f32 %v1823_v40, %v1201_v50  ;;  %v1328_v57 = vadd.f32 %v1265_v51, %v1264_v45  ;;  %1749 = vst [vmem:[#allocation7 + $0x80] sm:$0xff] %v1657_v54  }
 0x124   :  { %v1329_v59 = vadd.f32 %v1328_v57, %v1266_v55  ;;  %v1827_v60 = vpop.f32.mrb[4].mxu0  ;;  %v1203_v61 = vadd.f32 %v1824_v43, %v1202_v56  ;;  %v2109_v63 = vpop.f32.mrb[4].mxu1 }
 0x125   :  { %v255_v62 = vpop.f32.mrb[5].mxu0  ;;  %v2111_v4 = vpop.f32.mrb[5].mxu1  ;;  %v1270_v15 = vmul.f32 %v1827_v60, %v1827_v60 }
 0x126   :  { %v1204_v0 = vadd.f32 %v1203_v61, %v255_v62  ;;  %v1268_v1 = vmul.f32 %v255_v62, %v255_v62  ;;  %v1330_v2 = vadd.f32 %v1329_v59, %v1267_v58  ;;  %v1828_v3 = vpop.f32.mrb[6].mxu0  ;;  %v2113_v7 = vpop.f32.mrb[6].mxu1 }
 0x127   :  { %v1592_v5 = vpack.c.bf16 %v1828_v3, %v1827_v60  ;;  %v258_v6 = vpop.f32.mrb[7].mxu0  ;;  %v2115_v12 = vpop.f32.mrb[7].mxu1  ;;  %v1672_v13 = vpack.c.bf16 %v2113_v7, %v2109_v63  ;;  %v1271_v18 = vmul.f32 %v1828_v3, %v1828_v3 }
 0x128   :  { %v1331_v8 = vadd.f32 %v1330_v2, %v1268_v1  ;;  %v1587_v9 = vpack.c.bf16 %v258_v6, %v255_v62  ;;  %v1205_v10 = vadd.f32 %v1204_v0, %v258_v6  ;;  %v1269_v11 = vmul.f32 %v258_v6, %v258_v6 }
 0x129   :  { %1736 = vst [vmem:[#allocation7 + $0x18] sm:$0xff] %v1592_v5   ;;  %v1667_v14 = vpack.c.bf16 %v2115_v12, %v2111_v4  ;;  %1752 = vst [vmem:[#allocation7 + $0x98] sm:$0xff] %v1672_v13  }
 0x12a   :  { %1735 = vst [vmem:[#allocation7 + $0x10] sm:$0xff] %v1587_v9   ;;  %v1206_v16 = vadd.f32 %v1827_v60, %v1205_v10  ;;  %v1332_v17 = vadd.f32 %v1331_v8, %v1269_v11 }
 0x12b   :  { %1751 = vst [vmem:[#allocation7 + $0x90] sm:$0xff] %v1667_v14  }
 0x12c   :  { %v1333_v19 = vadd.f32 %v1332_v17, %v1270_v15  ;;  %v1831_v20 = vpop.f32.mrb[8].mxu0  ;;  %v1207_v21 = vadd.f32 %v1828_v3, %v1206_v16  ;;  %v2121_v23 = vpop.f32.mrb[8].mxu1 }
 0x12d   :  { %v271_v22 = vpop.f32.mrb[9].mxu0  ;;  %v2123_v28 = vpop.f32.mrb[9].mxu1  ;;  %v1274_v39 = vmul.f32 %v1831_v20, %v1831_v20 }
 0x12e   :  { %v1208_v24 = vadd.f32 %v1207_v21, %v271_v22  ;;  %v1272_v25 = vmul.f32 %v271_v22, %v271_v22  ;;  %v1334_v26 = vadd.f32 %v1333_v19, %v1271_v18  ;;  %v1832_v27 = vpop.f32.mrb[10].mxu0  ;;  %v2125_v31 = vpop.f32.mrb[10].mxu1 }
 0x12f   :  { %v1602_v29 = vpack.c.bf16 %v1832_v27, %v1831_v20  ;;  %v274_v30 = vpop.f32.mrb[11].mxu0  ;;  %v2127_v36 = vpop.f32.mrb[11].mxu1  ;;  %v1682_v37 = vpack.c.bf16 %v2125_v31, %v2121_v23  ;;  %v1275_v43 = vmul.f32 %v1832_v27, %v1832_v27 }
 0x130   :  { %v1335_v32 = vadd.f32 %v1334_v26, %v1272_v25  ;;  %v1597_v33 = vpack.c.bf16 %v274_v30, %v271_v22  ;;  %v1209_v34 = vadd.f32 %v1208_v24, %v274_v30  ;;  %v1273_v35 = vmul.f32 %v274_v30, %v274_v30 }
 0x131   :  { %1738 = vst [vmem:[#allocation7 + $0x28] sm:$0xff] %v1602_v29   ;;  %v1677_v38 = vpack.c.bf16 %v2127_v36, %v2123_v28  ;;  %1754 = vst [vmem:[#allocation7 + $0xa8] sm:$0xff] %v1682_v37  }
 0x132   :  { %1737 = vst [vmem:[#allocation7 + $0x20] sm:$0xff] %v1597_v33   ;;  %v1210_v40 = vadd.f32 %v1831_v20, %v1209_v34  ;;  %v1336_v41 = vadd.f32 %v1335_v32, %v1273_v35 }
 0x133   :  { %1753 = vst [vmem:[#allocation7 + $0xa0] sm:$0xff] %v1677_v38  }
 0x134   :  { %v1337_v45 = vadd.f32 %v1336_v41, %v1274_v39  ;;  %v1835_v46 = vpop.f32.mrb[12].mxu0  ;;  %v1211_v47 = vadd.f32 %v1832_v27, %v1210_v40  ;;  %v2133_v50 = vpop.f32.mrb[12].mxu1 }
 0x135   :  { %v287_v49 = vpop.f32.mrb[13].mxu0  ;;  %v2135_v56 = vpop.f32.mrb[13].mxu1  ;;  %v1278_v5 = vmul.f32 %v1835_v46, %v1835_v46 }
 0x136   :  { %v1212_v51 = vadd.f32 %v1211_v47, %v287_v49  ;;  %v1276_v52 = vmul.f32 %v287_v49, %v287_v49  ;;  %v1338_v54 = vadd.f32 %v1337_v45, %v1275_v43  ;;  %v1836_v55 = vpop.f32.mrb[14].mxu0  ;;  %v2137_v59 = vpop.f32.mrb[14].mxu1 }
 0x137   :  { %v1612_v57 = vpack.c.bf16 %v1836_v55, %v1835_v46  ;;  %v290_v58 = vpop.f32.mrb[15].mxu0  ;;  %v2139_v1 = vpop.f32.mrb[15].mxu1  ;;  %v1692_v2 = vpack.c.bf16 %v2137_v59, %v2133_v50  ;;  %v1279_v9 = vmul.f32 %v1836_v55, %v1836_v55 }
 0x138   :  { %v1339_v60 = vadd.f32 %v1338_v54, %v1276_v52  ;;  %v1607_v61 = vpack.c.bf16 %v290_v58, %v287_v49  ;;  %v1213_v62 = vadd.f32 %v1212_v51, %v290_v58  ;;  %v1277_v0 = vmul.f32 %v290_v58, %v290_v58 }
 0x139   :  { %1740 = vst [vmem:[#allocation7 + $0x38] sm:$0xff] %v1612_v57   ;;  %v1687_v3 = vpack.c.bf16 %v2139_v1, %v2135_v56  ;;  %1756 = vst [vmem:[#allocation7 + $0xb8] sm:$0xff] %v1692_v2  }
 0x13a   :  { %1739 = vst [vmem:[#allocation7 + $0x30] sm:$0xff] %v1607_v61   ;;  %v1214_v6 = vadd.f32 %v1835_v46, %v1213_v62  ;;  %v1340_v8 = vadd.f32 %v1339_v60, %v1277_v0 }
 0x13b   :  { %1755 = vst [vmem:[#allocation7 + $0xb0] sm:$0xff] %v1687_v3  }
 0x13c   :  { %v1341_v10 = vadd.f32 %v1340_v8, %v1278_v5  ;;  %v1839_v11 = vpop.f32.mrb[16].mxu0  ;;  %v1215_v13 = vadd.f32 %v1836_v55, %v1214_v6  ;;  %v2145_v15 = vpop.f32.mrb[16].mxu1 }
 0x13d   :  { %v303_v14 = vpop.f32.mrb[17].mxu0  ;;  %v2147_v20 = vpop.f32.mrb[17].mxu1  ;;  %v1282_v34 = vmul.f32 %v1839_v11, %v1839_v11 }
 0x13e   :  { %v1216_v16 = vadd.f32 %v1215_v13, %v303_v14  ;;  %v1280_v17 = vmul.f32 %v303_v14, %v303_v14  ;;  %v1342_v18 = vadd.f32 %v1341_v10, %v1279_v9  ;;  %v1840_v19 = vpop.f32.mrb[18].mxu0  ;;  %v2149_v24 = vpop.f32.mrb[18].mxu1 }
 0x13f   :  { %v1622_v21 = vpack.c.bf16 %v1840_v19, %v1839_v11  ;;  %v306_v22 = vpop.f32.mrb[19].mxu0  ;;  %v2151_v30 = vpop.f32.mrb[19].mxu1  ;;  %v1702_v32 = vpack.c.bf16 %v2149_v24, %v2145_v15  ;;  %v1283_v38 = vmul.f32 %v1840_v19, %v1840_v19 }
 0x140   :  { %v1343_v25 = vadd.f32 %v1342_v18, %v1280_v17  ;;  %v1617_v26 = vpack.c.bf16 %v306_v22, %v303_v14  ;;  %v1217_v27 = vadd.f32 %v1216_v16, %v306_v22  ;;  %v1281_v29 = vmul.f32 %v306_v22, %v306_v22 }
 0x141   :  { %1742 = vst [vmem:[#allocation7 + $0x48] sm:$0xff] %v1622_v21   ;;  %v1697_v33 = vpack.c.bf16 %v2151_v30, %v2147_v20  ;;  %1758 = vst [vmem:[#allocation7 + $0xc8] sm:$0xff] %v1702_v32  }
 0x142   :  { %1741 = vst [vmem:[#allocation7 + $0x40] sm:$0xff] %v1617_v26   ;;  %v1218_v35 = vadd.f32 %v1839_v11, %v1217_v27  ;;  %v1344_v37 = vadd.f32 %v1343_v25, %v1281_v29 }
 0x143   :  { %1757 = vst [vmem:[#allocation7 + $0xc0] sm:$0xff] %v1697_v33  }
 0x144   :  { %v1345_v39 = vadd.f32 %v1344_v37, %v1282_v34  ;;  %v1843_v40 = vpop.f32.mrb[20].mxu0  ;;  %v1219_v41 = vadd.f32 %v1840_v19, %v1218_v35  ;;  %v2157_v45 = vpop.f32.mrb[20].mxu1 }
 0x145   :  { %v319_v43 = vpop.f32.mrb[21].mxu0  ;;  %v2159_v52 = vpop.f32.mrb[21].mxu1  ;;  %v1286_v5 = vmul.f32 %v1843_v40, %v1843_v40 }
 0x146   :  { %v1220_v46 = vadd.f32 %v1219_v41, %v319_v43  ;;  %v1284_v47 = vmul.f32 %v319_v43, %v319_v43  ;;  %v1346_v49 = vadd.f32 %v1345_v39, %v1283_v38  ;;  %v1844_v51 = vpop.f32.mrb[22].mxu0  ;;  %v2161_v57 = vpop.f32.mrb[22].mxu1 }
 0x147   :  { %v1632_v54 = vpack.c.bf16 %v1844_v51, %v1843_v40  ;;  %v322_v55 = vpop.f32.mrb[23].mxu0  ;;  %v2163_v0 = vpop.f32.mrb[23].mxu1  ;;  %v1712_v2 = vpack.c.bf16 %v2161_v57, %v2157_v45  ;;  %v1287_v9 = vmul.f32 %v1844_v51, %v1844_v51 }
 0x148   :  { %v1347_v58 = vadd.f32 %v1346_v49, %v1284_v47  ;;  %v1627_v60 = vpack.c.bf16 %v322_v55, %v319_v43  ;;  %v1221_v61 = vadd.f32 %v1220_v46, %v322_v55  ;;  %v1285_v62 = vmul.f32 %v322_v55, %v322_v55 }
 0x149   :  { %1744 = vst [vmem:[#allocation7 + $0x58] sm:$0xff] %v1632_v54   ;;  %v1707_v3 = vpack.c.bf16 %v2163_v0, %v2159_v52  ;;  %1760 = vst [vmem:[#allocation7 + $0xd8] sm:$0xff] %v1712_v2  }
 0x14a   :  { %1743 = vst [vmem:[#allocation7 + $0x50] sm:$0xff] %v1627_v60   ;;  %v1222_v6 = vadd.f32 %v1843_v40, %v1221_v61  ;;  %v1348_v8 = vadd.f32 %v1347_v58, %v1285_v62 }
 0x14b   :  { %1759 = vst [vmem:[#allocation7 + $0xd0] sm:$0xff] %v1707_v3  }
 0x14c   :  { %v1349_v10 = vadd.f32 %v1348_v8, %v1286_v5  ;;  %v1847_v11 = vpop.f32.mrb[24].mxu0  ;;  %v1223_v13 = vadd.f32 %v1844_v51, %v1222_v6  ;;  %v2169_v16 = vpop.f32.mrb[24].mxu1 }
 0x14d   :  { %v335_v14 = vpop.f32.mrb[25].mxu0  ;;  %v2171_v22 = vpop.f32.mrb[25].mxu1  ;;  %v1290_v39 = vmul.f32 %v1847_v11, %v1847_v11 }
 0x14e   :  { %v1224_v17 = vadd.f32 %v1223_v13, %v335_v14  ;;  %v1288_v18 = vmul.f32 %v335_v14, %v335_v14  ;;  %v1350_v19 = vadd.f32 %v1349_v10, %v1287_v9  ;;  %v1848_v21 = vpop.f32.mrb[26].mxu0  ;;  %v2173_v27 = vpop.f32.mrb[26].mxu1 }
 0x14f   :  { %v1642_v25 = vpack.c.bf16 %v1848_v21, %v1847_v11  ;;  %v338_v26 = vpop.f32.mrb[27].mxu0  ;;  %v2175_v35 = vpop.f32.mrb[27].mxu1  ;;  %v1722_v37 = vpack.c.bf16 %v2173_v27, %v2169_v16  ;;  %v1291_v43 = vmul.f32 %v1848_v21, %v1848_v21 }
 0x150   :  { %v1351_v29 = vadd.f32 %v1350_v19, %v1288_v18  ;;  %v1637_v32 = vpack.c.bf16 %v338_v26, %v335_v14  ;;  %v1225_v33 = vadd.f32 %v1224_v17, %v338_v26  ;;  %v1289_v34 = vmul.f32 %v338_v26, %v338_v26 }
 0x151   :  { %1746 = vst [vmem:[#allocation7 + $0x68] sm:$0xff] %v1642_v25   ;;  %v1717_v38 = vpack.c.bf16 %v2175_v35, %v2171_v22  ;;  %1762 = vst [vmem:[#allocation7 + $0xe8] sm:$0xff] %v1722_v37  }
 0x152   :  { %1745 = vst [vmem:[#allocation7 + $0x60] sm:$0xff] %v1637_v32   ;;  %v1226_v40 = vadd.f32 %v1847_v11, %v1225_v33  ;;  %v1352_v41 = vadd.f32 %v1351_v29, %v1289_v34  ;;  %v1296_v29 = vmul.f32 %v2099_v44, %v2099_v44 }
 0x153   :  { %1761 = vst [vmem:[#allocation7 + $0xe0] sm:$0xff] %v1717_v38  }
 0x154   :  { %v1353_v46 = vadd.f32 %v1352_v41, %v1290_v39  ;;  %v1851_v47 = vpop.f32.mrb[28].mxu0  ;;  %v1227_v49 = vadd.f32 %v1848_v21, %v1226_v40  ;;  %v2181_v54 = vpop.f32.mrb[28].mxu1 }
 0x155   :  { %v351_v51 = vpop.f32.mrb[29].mxu0  ;;  %v2183_v62 = vpop.f32.mrb[29].mxu1  ;;  %v1294_v17 = vmul.f32 %v1851_v47, %v1851_v47 }
 0x156   :  { %v1228_v55 = vadd.f32 %v1227_v49, %v351_v51  ;;  %v1292_v58 = vmul.f32 %v351_v51, %v351_v51  ;;  %v1354_v60 = vadd.f32 %v1353_v46, %v1291_v43  ;;  %v1852_v61 = vpop.f32.mrb[30].mxu0  ;;  %v2185_v5 = vpop.f32.mrb[30].mxu1 }
 0x157   :  { %v1652_v2 = vpack.c.bf16 %v1852_v61, %v1851_v47  ;;  %v354_v3 = vpop.f32.mrb[31].mxu0  ;;  %v2187_v11 = vpop.f32.mrb[31].mxu1  ;;  %v1732_v13 = vpack.c.bf16 %v2185_v5, %v2181_v54  ;;  %v1295_v21 = vmul.f32 %v1852_v61, %v1852_v61 }
 0x158   :  { %v1355_v6 = vadd.f32 %v1354_v60, %v1292_v58  ;;  %v1647_v8 = vpack.c.bf16 %v354_v3, %v351_v51  ;;  %v1229_v9 = vadd.f32 %v1228_v55, %v354_v3  ;;  %v1293_v10 = vmul.f32 %v354_v3, %v354_v3 }
 0x159   :  { %1748 = vst [vmem:[#allocation7 + $0x78] sm:$0xff] %v1652_v2   ;;  %v1727_v14 = vpack.c.bf16 %v2187_v11, %v2183_v62  ;;  %1764 = vst [vmem:[#allocation7 + $0xf8] sm:$0xff] %v1732_v13  }
 0x15a   :  { %1747 = vst [vmem:[#allocation7 + $0x70] sm:$0xff] %v1647_v8   ;;  %v1230_v18 = vadd.f32 %v1851_v47, %v1229_v9  ;;  %v1356_v19 = vadd.f32 %v1355_v6, %v1293_v10 }
 0x15b   :  { %1763 = vst [vmem:[#allocation7 + $0xf0] sm:$0xff] %v1727_v14  }
 0x15c   :  { %v1357_v25 = vadd.f32 %v1356_v19, %v1294_v17  ;;  %v1231_v26 = vadd.f32 %v1852_v61, %v1230_v18 }
 0x15d   :  { %1973 = shalt.err (!%p1970_p6)
}
 0x15e   :  { %s1974_s20 = scalar_lea.hbm %s2330_s2, 4096 }
 0x15f   :  { %p1975_p7 = scmp.ne.s32.totalorder %s2330_s2, %s1974_s20  ;;  %p1978_p8 = scmp.lt.u32.totalorder %s1974_s20, %s2330_s2 }
 0x161   :  { %p1980_p9 = pnand %p1978_p8, %p1975_p7 }
 0x163   :  { %1983 = shalt.err (!%p1980_p9)
}
 0x164   :  { %1404 = dma.vmem_to_hbm [thread:$0]  %s1399_s16, 4096, %s2330_s2, [#allocation4], %s2040_s0, %s2040_s0, %s2041_s13   ;;  %v1232_v32 = vadd.f32 %v1231_v26, %v2099_v44  ;;  %v1358_v33 = vadd.f32 %v1357_v25, %v1295_v21  ;;  %v1297_v38 = vmul.f32 %v2105_v53, %v2105_v53  ;;  %v1298_v39 = vmul.f32 %v2097_v42, %v2097_v42 }
 0x165   :  { %v1299_v43 = vmul.f32 %v2101_v48, %v2101_v48  ;;  %v1300_v44 = vmul.f32 %v2111_v4, %v2111_v4  ;;  %v1301_v58 = vmul.f32 %v2115_v12, %v2115_v12  ;;  %v1305_v10 = vmul.f32 %v2127_v36, %v2127_v36  ;;  %s2043_s2 = smov [#allocation8]   ;;  %s2044_s28 = smov [#allocation10]  }
 0x166   :  { %v1359_v34 = vadd.f32 %v1358_v33, %v1296_v29  ;;  %v1233_v37 = vadd.f32 %v1232_v32, %v2105_v53  ;;  %v1309_v26 = vmul.f32 %v2139_v1, %v2139_v1  ;;  %s1411_s27 = sshll.u32 %s2043_s2, 4  ;;  %s1421_s29 = sshll.u32 %s2044_s28, 4  ;;  %s1412_s27 = int_to_ptr.vmem [resolvable:$true] %s1411_s27  ;;  %s1422_s29 = int_to_ptr.vmem [resolvable:$true] %s1421_s29 }
 0x167   :  { %s1984_s30 = scalar_lea.vmem %s1412_s27, 128  ;;  %p1989_p11 = scmp.lt.s32.totalorder %s1412_s27, %s1412_s27 }
 0x168   :  { %v1234_v40 = vadd.f32 %v2097_v42, %v1233_v37  ;;  %v1360_v41 = vadd.f32 %v1359_v34, %v1297_v38  ;;  %v1302_v42 = vmul.f32 %v2109_v63, %v2109_v63  ;;  %p1985_p10 = scmp.ne.s32.totalorder %s1412_s27, %s1984_s30  ;;  %p1990_p12 = scmp.lt.s32.totalorder %s1984_s30, %s1984_s30 }
 0x16a   :  { %v1361_v46 = vadd.f32 %v1360_v41, %v1298_v39  ;;  %v1235_v47 = vadd.f32 %v2101_v48, %v1234_v40  ;;  %v1303_v48 = vmul.f32 %v2113_v7, %v2113_v7  ;;  %v1313_v40 = vmul.f32 %v2151_v30, %v2151_v30  ;;  %p1991_p13 = por %p1990_p12, %p1989_p11 }
 0x16c   :  { %v1236_v49 = vadd.f32 %v1235_v47, %v2111_v4  ;;  %v1362_v51 = vadd.f32 %v1361_v46, %v1299_v43  ;;  %v1304_v4 = vmul.f32 %v2123_v28, %v2123_v28  ;;  %p1992_p0 = pnand %p1991_p13, %p1985_p10 }
 0x16e   :  { %v1363_v55 = vadd.f32 %v1362_v51, %v1300_v44  ;;  %v1237_v53 = vadd.f32 %v1236_v49, %v2115_v12 }
 0x170   :  { %v1238_v60 = vadd.f32 %v2109_v63, %v1237_v53  ;;  %v1364_v61 = vadd.f32 %v1363_v55, %v1301_v58  ;;  %v1306_v63 = vmul.f32 %v2121_v23, %v2121_v23  ;;  %v1317_v55 = vmul.f32 %v2163_v0, %v2163_v0 }
 0x172   :  { %v1365_v2 = vadd.f32 %v1364_v61, %v1302_v42  ;;  %v1239_v3 = vadd.f32 %v2113_v7, %v1238_v60  ;;  %v1307_v7 = vmul.f32 %v2125_v31, %v2125_v31 }
 0x174   :  { %v1240_v6 = vadd.f32 %v1239_v3, %v2123_v28  ;;  %v1366_v8 = vadd.f32 %v1365_v2, %v1303_v48  ;;  %v1308_v28 = vmul.f32 %v2135_v56, %v2135_v56  ;;  %v1321_v3 = vmul.f32 %v2175_v35, %v2175_v35 }
 0x176   :  { %v1367_v9 = vadd.f32 %v1366_v8, %v1304_v4  ;;  %v1241_v12 = vadd.f32 %v1240_v6, %v2127_v36 }
 0x178   :  { %v1242_v13 = vadd.f32 %v2121_v23, %v1241_v12  ;;  %v1368_v14 = vadd.f32 %v1367_v9, %v1305_v10  ;;  %v1310_v23 = vmul.f32 %v2133_v50, %v2133_v50 }
 0x17a   :  { %v1369_v17 = vadd.f32 %v1368_v14, %v1306_v63  ;;  %v1243_v18 = vadd.f32 %v2125_v31, %v1242_v13  ;;  %v1311_v31 = vmul.f32 %v2137_v59, %v2137_v59  ;;  %v1325_v13 = vmul.f32 %v2187_v11, %v2187_v11 }
 0x17c   :  { %v1244_v19 = vadd.f32 %v1243_v18, %v2135_v56  ;;  %v1370_v21 = vadd.f32 %v1369_v17, %v1307_v7  ;;  %v1312_v56 = vmul.f32 %v2147_v20, %v2147_v20 }
 0x17e   :  { %v1371_v25 = vadd.f32 %v1370_v21, %v1308_v28  ;;  %v1245_v36 = vadd.f32 %v1244_v19, %v2139_v1 }
 0x180   :  { %v1246_v29 = vadd.f32 %v2133_v50, %v1245_v36  ;;  %v1372_v32 = vadd.f32 %v1371_v25, %v1309_v26  ;;  %v1314_v50 = vmul.f32 %v2145_v15, %v2145_v15 }
 0x182   :  { %v1373_v33 = vadd.f32 %v1372_v32, %v1310_v23  ;;  %v1247_v34 = vadd.f32 %v2137_v59, %v1246_v29  ;;  %v1315_v59 = vmul.f32 %v2149_v24, %v2149_v24 }
 0x184   :  { %v1248_v37 = vadd.f32 %v1247_v34, %v2147_v20  ;;  %v1374_v38 = vadd.f32 %v1373_v33, %v1311_v31  ;;  %v1316_v20 = vmul.f32 %v2159_v52, %v2159_v52 }
 0x186   :  { %v1375_v39 = vadd.f32 %v1374_v38, %v1312_v56  ;;  %v1249_v1 = vadd.f32 %v1248_v37, %v2151_v30 }
 0x188   :  { %v1250_v41 = vadd.f32 %v2145_v15, %v1249_v1  ;;  %v1376_v43 = vadd.f32 %v1375_v39, %v1313_v40  ;;  %v1318_v15 = vmul.f32 %v2157_v45, %v2157_v45 }
 0x18a   :  { %v1377_v46 = vadd.f32 %v1376_v43, %v1314_v50  ;;  %v1251_v47 = vadd.f32 %v2149_v24, %v1250_v41  ;;  %v1319_v24 = vmul.f32 %v2161_v57, %v2161_v57 }
 0x18c   :  { %v1252_v44 = vadd.f32 %v1251_v47, %v2159_v52  ;;  %v1378_v49 = vadd.f32 %v1377_v46, %v1315_v59  ;;  %v1320_v52 = vmul.f32 %v2171_v22, %v2171_v22 }
 0x18e   :  { %v1379_v51 = vadd.f32 %v1378_v49, %v1316_v20  ;;  %v1253_v30 = vadd.f32 %v1252_v44, %v2163_v0 }
 0x190   :  { %v1254_v53 = vadd.f32 %v2157_v45, %v1253_v30  ;;  %v1380_v58 = vadd.f32 %v1379_v51, %v1317_v55  ;;  %v1322_v45 = vmul.f32 %v2169_v16, %v2169_v16 }
 0x192   :  { %v1381_v42 = vadd.f32 %v1380_v58, %v1318_v15  ;;  %v1255_v60 = vadd.f32 %v2161_v57, %v1254_v53  ;;  %v1323_v57 = vmul.f32 %v2173_v27, %v2173_v27 }
 0x194   :  { %v1256_v61 = vadd.f32 %v1255_v60, %v2171_v22  ;;  %v1382_v48 = vadd.f32 %v1381_v42, %v1319_v24  ;;  %v1324_v22 = vmul.f32 %v2183_v62, %v2183_v62 }
 0x196   :  { %v1383_v2 = vadd.f32 %v1382_v48, %v1320_v52  ;;  %v1257_v0 = vadd.f32 %v1256_v61, %v2175_v35 }
 0x198   :  { %v1258_v4 = vadd.f32 %v2169_v16, %v1257_v0  ;;  %v1384_v6 = vadd.f32 %v1383_v2, %v1321_v3  ;;  %v1326_v16 = vmul.f32 %v2181_v54, %v2181_v54 }
 0x19a   :  { %v1385_v8 = vadd.f32 %v1384_v6, %v1322_v45  ;;  %v1259_v9 = vadd.f32 %v2173_v27, %v1258_v4 }
 0x19c   :  { %v1260_v12 = vadd.f32 %v1259_v9, %v2183_v62  ;;  %v1386_v10 = vadd.f32 %v1385_v8, %v1323_v57  ;;  %v1327_v62 = vmul.f32 %v2185_v5, %v2185_v5 }
 0x19e   :  { %v1387_v63 = vadd.f32 %v1386_v10, %v1324_v22  ;;  %v1261_v35 = vadd.f32 %v1260_v12, %v2187_v11 }
 0x1a0   :  { %v1262_v14 = vadd.f32 %v2181_v54, %v1261_v35  ;;  %v1388_v27 = vadd.f32 %v1387_v63, %v1325_v13 }
 0x1a2   :  { %v1389_v7 = vadd.f32 %v1388_v27, %v1326_v16  ;;  %v1263_v17 = vadd.f32 %v2185_v5, %v1262_v14 }
 0x1a4   :  { %1391 = vst [vmem:[#allocation8] sm:$0xff] %v1263_v17  ;;  %v1390_v18 = vadd.f32 %v1389_v7, %v1327_v62 }
 0x1a5   :  { %1995 = shalt.err (!%p1992_p0)
}
 0x1a6   :  { %s1996_s7 = scalar_lea.hbm %s2331_s3, 128 }
 0x1a7   :  { %p1997_p1 = scmp.ne.s32.totalorder %s2331_s3, %s1996_s7  ;;  %p2000_p2 = scmp.lt.u32.totalorder %s1996_s7, %s2331_s3 }
 0x1a9   :  { %p2002_p3 = pnand %p2000_p2, %p1997_p1 }
 0x1ab   :  { %2005 = shalt.err (!%p2002_p3)
}
 0x1ac   :  { %1414 = dma.vmem_to_hbm [thread:$0]  %s1412_s27, 128, %s2331_s3, [#allocation9]   ;;  %1392 = vst [vmem:[#allocation10] sm:$0xff] %v1390_v18 }
 0x1ad   :  { %s2006_s13 = scalar_lea.vmem %s1422_s29, 128  ;;  %p2011_p5 = scmp.lt.s32.totalorder %s1422_s29, %s1422_s29 }
 0x1ae   :  { %p2007_p4 = scmp.ne.s32.totalorder %s1422_s29, %s2006_s13  ;;  %p2012_p6 = scmp.lt.s32.totalorder %s2006_s13, %s2006_s13 }
 0x1b0   :  { %p2013_p7 = por %p2012_p6, %p2011_p5 }
 0x1b2   :  { %p2014_p8 = pnand %p2013_p7, %p2007_p4 }
 0x1b4   :  { %2017 = shalt.err (!%p2014_p8)
}
 0x1b5   :  { %s2018_s1 = scalar_lea.hbm %s2332_s4, 128 }
 0x1b6   :  { %p2019_p9 = scmp.ne.s32.totalorder %s2332_s4, %s2018_s1  ;;  %p2022_p10 = scmp.lt.u32.totalorder %s2018_s1, %s2332_s4 }
 0x1b8   :  { %p2024_p11 = pnand %p2022_p10, %p2019_p9 }
 0x1ba   :  { %2027 = shalt.err (!%p2024_p11)
}
 0x1bb   :  { %1424 = dma.vmem_to_hbm [thread:$0]  %s1422_s29, 128, %s2332_s4, [#allocation9]  }
 0x1bc   :  { %2032 = dma.done.wait [#allocation4], 4096  }
 0x1bd   :  { %2033 = vsyncadd [#allocation4], 4294963200 }
 0x1be   :  { %2034 = dma.done.wait [#allocation9], 256  }
 0x1bf   :  { %2035 = vsyncadd [#allocation9], 4294967040 }
 0x1c0   :  { %1434 = vsyncpa [#allocation3], 1 }
 0x1c1   :  { %1435 = vsyncpa [#allocation6], 1 }
 0x1c2   :  { %1436 = vsyncpa [#allocation4], 1 }
 0x1c3   :  { %1437 = vsyncpa [#allocation9], 1 }

</bundles_post_ra>
